<compile_context>
chip_gen: v7x
topology: tpu7x:2x2x1
jax: 0.10.0
libtpu: 0.0.40
codegen_flags: <defaults>
</compile_context>

<pallas_src>
import functools

import jax
import jax.numpy as jnp
import numpy as np
from jax.experimental import pallas as pl
from jax.experimental.pallas import tpu as pltpu


def _round_up(a, m):
    return (a + m - 1) // m * m


def _chip_info():
    """Returns (tensorcores_per_chip, default_scoped_vmem, physical_vmem, conv2_fused_default)."""
    kind = ""
    try:
        kind = (getattr(jax.devices()[0], "device_kind", "") or "").lower()
    except Exception:
        pass
    is_v7 = ("v7" in kind) or ("7x" in kind)
    is_v5e = ("v5e" in kind) or ("v5 lite" in kind) or ("v5lite" in kind)
    n_cores = 2 if is_v7 else 1
    default_scoped = (16 << 20) if is_v5e else (32 << 20)
    phys_vmem = (64 << 20) if is_v7 else (128 << 20)
    try:  # prefer exact capacity when the query is available
        cap = getattr(pltpu.get_tpu_info(), "vmem_capacity_bytes", None)
        if cap:
            phys_vmem = int(cap)
    except Exception:
        pass
    # v5e: avoid materializing the 192-lane im2col buffer (single vst slot);
    # TODO(synk): sweep fused-vs-tap conv2 on real v5e hardware.
    conv2_fused_default = not is_v5e
    return n_cores, default_scoped, phys_vmem, conv2_fused_default


def _cnn_kernel(x_ref, w1_ref, b1_ref, w2_ref, b2_ref,
                wf1_ref, bf1_ref, wf2_ref, bf2_ref, out_ref,
                *, conv2_fused, mm_dtype):
    L1, TB, K1 = x_ref.shape          # x is pre-im2col'd: K1 = 3*Cin
    L2 = L1 // 2                      # after pool1
    L3 = L2 // 2                      # after pool2

    # ---- conv1 as one fused im2col matmul (K = 3*Cin) + ReLU ----------------
    # Row index = l*TB + b; lane index = k*Cin + c (matches w1 row layout).
    x2d = x_ref[...].reshape(L1 * TB, K1).astype(mm_dtype)
    h1 = jnp.dot(x2d, w1_ref[...], preferred_element_type=jnp.float32)
    h1 = jnp.maximum(h1 + b1_ref[...], 0.0)                      # (L1*TB, 64) f32

    # ---- MaxPool1d(2): max over rows (2j)*TB+b and (2j+1)*TB+b --------------
    h1 = h1[:2 * L2 * TB].reshape(L2, 2 * TB, 64)
    p1 = jnp.maximum(h1[:, :TB, :], h1[:, TB:, :]).reshape(L2 * TB, 64)
    p1m = p1.astype(mm_dtype)

    # ---- conv2 (kernel=3, padding=1) + ReLU ---------------------------------
    zpad = jnp.zeros((TB, 64), mm_dtype)
    if conv2_fused:
        # One K=192 im2col matmul (single MXU pass on the 256-deep v6e/v7x MXU).
        left = jnp.concatenate([zpad, p1m[:(L2 - 1) * TB]], axis=0)     # p1[j-1]
        right = jnp.concatenate([p1m[TB:], zpad], axis=0)               # p1[j+1]
        lhs2 = jnp.concatenate([left, p1m, right], axis=-1)             # (L2*TB, 192)
        h2 = jnp.dot(lhs2, w2_ref[...], preferred_element_type=jnp.float32)
    else:
        # Three accumulated K=64 taps on row-shifted windows of one padded copy.
        p1p = jnp.concatenate([zpad, p1m, zpad], axis=0)                # ((L2+2)*TB, 64)
        h2 = jnp.dot(p1p[0:L2 * TB], w2_ref[0:64],
                     preferred_element_type=jnp.float32)
        h2 = h2 + jnp.dot(p1p[TB:(L2 + 1) * TB], w2_ref[64:128],
                          preferred_element_type=jnp.float32)
        h2 = h2 + jnp.dot(p1p[2 * TB:(L2 + 2) * TB], w2_ref[128:192],
                          preferred_element_type=jnp.float32)
    h2 = jnp.maximum(h2 + b2_ref[...], 0.0)                       # (L2*TB, 32) f32

    # ---- MaxPool1d(2) --------------------------------------------------------
    h2 = h2[:2 * L3 * TB].reshape(L3, 2 * TB, 32)
    p2 = jnp.maximum(h2[:, :TB, :], h2[:, TB:, :])                # (L3, TB, 32)

    # ---- Flatten + fc1 + ReLU: one (TB, L3*32) x (L3*32, 100) matmul --------
    # Lane order l*32 + c; wf1 was pre-permuted to match PyTorch's Flatten.
    flat = jnp.concatenate([p2[l] for l in range(L3)], axis=-1).astype(mm_dtype)
    h3 = jnp.dot(flat, wf1_ref[...], preferred_element_type=jnp.float32)
    h3 = jnp.maximum(h3 + bf1_ref[...], 0.0)                      # (TB, 100)

    # ---- fc2: lane-dense padded output (TB, OUT_PAD) ------------------------
    out_ref[...] = (jnp.dot(h3.astype(mm_dtype), wf2_ref[...],
                            preferred_element_type=jnp.float32)
                    + bf2_ref[...])


def cnn_forward(x, kernel_params, *, block_b=None, mm_dtype=jnp.bfloat16,
                conv2_fused=None):
    """x: (B, T, Cin) float32 -> (B, OUT) float32."""
    B, T, Cin = x.shape
    w1, b1, w2, b2, wf1, bf1, wf2, bf2 = kernel_params
    OUT = wf2.shape[-1]
    L1 = T - 2
    L2 = L1 // 2
    L3 = L2 // 2
    assert L3 >= 1, "step must be >= 6"
    OUT_PAD = _round_up(max(OUT, 1), 128)
    LANE = 128
    f32b = 4
    mmb = jnp.dtype(mm_dtype).itemsize

    n_cores, default_scoped, phys_vmem, fused_default = _chip_info()
    if conv2_fused is None:
        conv2_fused = fused_default

    # ---- per-batch-row VMEM footprint estimate (128-lane padded) ------------
    def lane_bytes(n, w):
        return _round_up(max(n, 1), LANE) * w

    per_row = (
        2 * L1 * lane_bytes(3 * Cin, f32b)                       # x block (dbl-buffered)
        + L1 * lane_bytes(64, f32b)                              # h1
        + L2 * lane_bytes(64, f32b + mmb)                        # p1 + matmul copy
        + L2 * (2 * lane_bytes(64, mmb) + lane_bytes(192, mmb))  # conv2 im2col bufs
        + L2 * lane_bytes(32, f32b)                              # h2
        + L3 * lane_bytes(32, f32b) + lane_bytes(L3 * 32, mmb)   # p2 + flat
        + lane_bytes(100, f32b + mmb)                            # h3
        + 2 * lane_bytes(OUT_PAD, f32b)                          # out block (dbl-buffered)
    )
    weight_bytes = (3 * Cin * lane_bytes(64, mmb) + 192 * lane_bytes(32, mmb)
                    + L3 * 32 * lane_bytes(100, mmb)
                    + 100 * lane_bytes(OUT_PAD, mmb)
                    + 4 * lane_bytes(OUT_PAD, f32b))

    # ---- generation-aware batch block ----------------------------------------
    b8 = _round_up(B, 8)
    budget = max(per_row, int(0.5 * phys_vmem) - weight_bytes)
    tb_cap = max(8, min(512, (budget // per_row) // 8 * 8))
    if block_b is not None:
        TB = max(8, _round_up(min(block_b, b8), 8))
    elif n_cores >= 2 and b8 >= 16:
        # v7x: split across both TensorCores, keep the block count even.
        nb = max(2, pl.cdiv(b8, tb_cap))
        nb = nb + (nb % 2)
        TB = _round_up(pl.cdiv(b8, nb), 8)
    else:
        # v5e / v6e: single block whenever it fits VMEM (no padding, no extra steps).
        TB = min(b8, tb_cap)
    B_pad = _round_up(b8, TB)
    nb = B_pad // TB

    # ---- conv1 im2col input in wrapper: (L1, B_pad, 3*Cin), batch on sublanes
    xt = jnp.transpose(x, (1, 0, 2))                              # (T, B, Cin)
    x_col = jnp.concatenate([xt[0:L1], xt[1:L1 + 1], xt[2:L1 + 2]], axis=-1)
    if B_pad != B:
        x_col = jnp.pad(x_col, ((0, 0), (0, B_pad - B), (0, 0)))

    # ---- weights in kernel layout / matmul dtype; lane-dense padded fc2 ------
    w1k = w1.reshape(3 * Cin, 64).astype(mm_dtype)                # row = k*Cin + c
    w2k = w2.astype(mm_dtype)                                     # (192, 32), row = k*64 + c
    wf1k = wf1.astype(mm_dtype)                                   # (L3*32, 100)
    wf2k = jnp.pad(wf2, ((0, 0), (0, OUT_PAD - OUT))).astype(mm_dtype)
    bf2k = jnp.pad(bf2, ((0, 0), (0, OUT_PAD - OUT)))             # f32

    est = per_row * TB + weight_bytes
    cp = dict(dimension_semantics=("parallel",))
    if est > default_scoped:
        cp["vmem_limit_bytes"] = int(min(est * 1.5, 0.8 * phys_vmem))

    kernel = functools.partial(_cnn_kernel, conv2_fused=bool(conv2_fused),
                               mm_dtype=mm_dtype)
    out = pl.pallas_call(
        kernel,
        out_shape=jax.ShapeDtypeStruct((B_pad, OUT_PAD), jnp.float32),
        grid=(nb,),
        in_specs=[
            pl.BlockSpec((L1, TB, 3 * Cin), lambda i: (0, i, 0)),   # x (im2col)
            pl.BlockSpec((3 * Cin, 64), lambda i: (0, 0)),          # conv1 w
            pl.BlockSpec((1, 64), lambda i: (0, 0)),                # conv1 b
            pl.BlockSpec((3 * 64, 32), lambda i: (0, 0)),           # conv2 w (im2col)
            pl.BlockSpec((1, 32), lambda i: (0, 0)),                # conv2 b
            pl.BlockSpec((L3 * 32, 100), lambda i: (0, 0)),         # fc1 w
            pl.BlockSpec((1, 100), lambda i: (0, 0)),               # fc1 b
            pl.BlockSpec((100, OUT_PAD), lambda i: (0, 0)),         # fc2 w (padded)
            pl.BlockSpec((1, OUT_PAD), lambda i: (0, 0)),           # fc2 b (padded)
        ],
        out_specs=pl.BlockSpec((TB, OUT_PAD), lambda i: (i, 0)),
        compiler_params=pltpu.CompilerParams(**cp),
    )(x_col, w1k, b1, w2k, b2, wf1k, bf1, wf2k, bf2k)
    return out[:B, :OUT]


def init_params(key, input_dim, output_dim, step):
    """Deterministic synthetic params in PyTorch-native shapes + kernel layout."""
    L3 = (step - 2) // 2 // 2
    ks = jax.random.split(key, 8)
    s = 0.1
    conv1_w = s * jax.random.normal(ks[0], (64, input_dim, 3), jnp.float32)
    conv1_b = s * jax.random.normal(ks[1], (64,), jnp.float32)
    conv2_w = s * jax.random.normal(ks[2], (32, 64, 3), jnp.float32)
    conv2_b = s * jax.random.normal(ks[3], (32,), jnp.float32)
    fc1_w = s * jax.random.normal(ks[4], (100, 32 * L3), jnp.float32)
    fc1_b = s * jax.random.normal(ks[5], (100,), jnp.float32)
    fc2_w = s * jax.random.normal(ks[6], (output_dim, 100), jnp.float32)
    fc2_b = s * jax.random.normal(ks[7], (output_dim,), jnp.float32)
    torch_params = (conv1_w, conv1_b, conv2_w, conv2_b,
                    fc1_w, fc1_b, fc2_w, fc2_b)

    # Kernel layouts (f32; cnn_forward casts/pads per chip generation).
    w1 = jnp.transpose(conv1_w, (2, 1, 0))                        # (3, Cin, 64)
    b1 = conv1_b.reshape(1, 64)
    w2 = jnp.transpose(conv2_w, (2, 1, 0)).reshape(3 * 64, 32)    # row = k*64 + c_in
    b2 = conv2_b.reshape(1, 32)
    # PyTorch Flatten column = c*L3 + l; kernel lane index = l*32 + c.
    wf1 = jnp.transpose(fc1_w.reshape(100, 32, L3),
                        (2, 1, 0)).reshape(L3 * 32, 100)          # (L3*32, 100)
    bf1 = fc1_b.reshape(1, 100)
    wf2 = jnp.transpose(fc2_w, (1, 0))                            # (100, OUT)
    bf2 = fc2_b.reshape(1, output_dim)
    kernel_params = (w1, b1, w2, b2, wf1, bf1, wf2, bf2)
    return torch_params, kernel_params


def torch_reference(x, torch_params):
    """Plain-JAX replica of the PyTorch forward (for verification only)."""
    (conv1_w, conv1_b, conv2_w, conv2_b,
     fc1_w, fc1_b, fc2_w, fc2_b) = torch_params
    dn = ("NCH", "OIH", "NCH")
    xt = jnp.transpose(x, (0, 2, 1))                              # (B, Cin, T)
    h = jax.lax.conv_general_dilated(xt, conv1_w, (1,), "VALID",
                                     dimension_numbers=dn)
    h = jnp.maximum(h + conv1_b[None, :, None], 0.0)
    B, C, L = h.shape
    h = jnp.max(h.reshape(B, C, L // 2, 2), axis=-1)
    h = jax.lax.conv_general_dilated(h, conv2_w, (1,), ((1, 1),),
                                     dimension_numbers=dn)
    h = jnp.maximum(h + conv2_b[None, :, None], 0.0)
    B, C, L = h.shape
    h = jnp.max(h.reshape(B, C, L // 2, 2), axis=-1)
    h = h.reshape(B, -1)                                          # (B, 32*L3)
    h = jnp.maximum(h @ fc1_w.T + fc1_b, 0.0)
    return h @ fc2_w.T + fc2_b


if __name__ == "__main__":
    # (18-2)//2//2 = 4 -> fc1 input = 128; B=20 exercises padding + blocking.
    B, INPUT_DIM, OUTPUT_DIM, STEP = 20, 4, 8, 18
    key = jax.random.PRNGKey(0)
    kx, kp = jax.random.split(key)
    x = jax.random.normal(kx, (B, STEP, INPUT_DIM), jnp.float32)

    torch_params, kernel_params = init_params(kp, INPUT_DIM, OUTPUT_DIM, STEP)
    ref = np.asarray(torch_reference(x, torch_params))

    # bf16 matmul operands -> relax tolerance vs the f32 reference.
    RTOL, ATOL = 2e-2, 3e-2

    # Default, chip-tuned configuration.
    out = jax.block_until_ready(cnn_forward(x, kernel_params))
    np.testing.assert_allclose(np.asarray(out), ref, rtol=RTOL, atol=ATOL)

    # Exercise both conv2 code paths and the multi-block grid path regardless
    # of which TPU generation this happens to run on.
    out_tap = jax.block_until_ready(
        cnn_forward(x, kernel_params, block_b=8, conv2_fused=False))
    np.testing.assert_allclose(np.asarray(out_tap), ref, rtol=RTOL, atol=ATOL)

    out_fused = jax.block_until_ready(
        cnn_forward(x, kernel_params, block_b=16, conv2_fused=True))
    np.testing.assert_allclose(np.asarray(out_fused), ref, rtol=RTOL, atol=ATOL)

    print("KERNEL_OK")
</pallas_src>

<mosaic_0001>
module attributes {stable_mosaic.version = 11 : i64} {
  func.func @_cnn_kernel(%arg0: i32, %arg1: memref<16x24x12xf32, #tpu.memory_space<vmem>>, %arg2: memref<12x64xbf16, #tpu.memory_space<vmem>>, %arg3: memref<1x64xf32, #tpu.memory_space<vmem>>, %arg4: memref<192x32xbf16, #tpu.memory_space<vmem>>, %arg5: memref<1x32xf32, #tpu.memory_space<vmem>>, %arg6: memref<128x100xbf16, #tpu.memory_space<vmem>>, %arg7: memref<1x100xf32, #tpu.memory_space<vmem>>, %arg8: memref<100x128xbf16, #tpu.memory_space<vmem>>, %arg9: memref<1x128xf32, #tpu.memory_space<vmem>>, %arg10: memref<24x128xf32, #tpu.memory_space<vmem>>) attributes {dimension_semantics = [#tpu.dimension_semantics<parallel>], iteration_bounds = array<i64: 1>, scalar_prefetch = 0 : i64, scratch_operands = 0 : i64, tpu.core_type = #tpu.core_type<tc>, window_params = [{transform_indices = @transform_0, window_bounds = array<i64: 16, 24, 12>}, {pipeline_mode = #tpu.pipeline_mode<synchronous>, transform_indices = @transform_1, window_bounds = array<i64: 12, 64>}, {pipeline_mode = #tpu.pipeline_mode<synchronous>, transform_indices = @transform_2, window_bounds = array<i64: 1, 64>}, {pipeline_mode = #tpu.pipeline_mode<synchronous>, transform_indices = @transform_3, window_bounds = array<i64: 192, 32>}, {pipeline_mode = #tpu.pipeline_mode<synchronous>, transform_indices = @transform_4, window_bounds = array<i64: 1, 32>}, {pipeline_mode = #tpu.pipeline_mode<synchronous>, transform_indices = @transform_5, window_bounds = array<i64: 128, 100>}, {pipeline_mode = #tpu.pipeline_mode<synchronous>, transform_indices = @transform_6, window_bounds = array<i64: 1, 100>}, {pipeline_mode = #tpu.pipeline_mode<synchronous>, transform_indices = @transform_7, window_bounds = array<i64: 100, 128>}, {pipeline_mode = #tpu.pipeline_mode<synchronous>, transform_indices = @transform_8, window_bounds = array<i64: 1, 128>}, {transform_indices = @transform_9, window_bounds = array<i64: 24, 128>}]} {
    %c0 = arith.constant 0 : index
    %c0_0 = arith.constant 0 : index
    %c0_1 = arith.constant 0 : index
    %0 = vector.load %arg1[%c0, %c0_0, %c0_1] : memref<16x24x12xf32, #tpu.memory_space<vmem>>, vector<16x24x12xf32>
    %1 = vector.shape_cast %0 : vector<16x24x12xf32> to vector<384x12xf32>
    %2 = arith.truncf %1 : vector<384x12xf32> to vector<384x12xbf16>
    %c0_2 = arith.constant 0 : index
    %c0_3 = arith.constant 0 : index
    %3 = vector.load %arg2[%c0_2, %c0_3] : memref<12x64xbf16, #tpu.memory_space<vmem>>, vector<12x64xbf16>
    %cst = arith.constant dense<0.000000e+00> : vector<384x64xf32>
    %4 = tpu.matmul %2, %3, %cst {dimension_numbers = #tpu.dot_dimension_numbers<[1], [0], [0], [1], [0, 0, 1, 1], [], []>} : vector<384x12xbf16>, vector<12x64xbf16>, vector<384x64xf32> -> vector<384x64xf32>
    %c0_4 = arith.constant 0 : index
    %c0_5 = arith.constant 0 : index
    %5 = vector.load %arg3[%c0_4, %c0_5] : memref<1x64xf32, #tpu.memory_space<vmem>>, vector<1x64xf32>
    %6 = vector.broadcast %5 : vector<1x64xf32> to vector<384x64xf32>
    %7 = arith.addf %4, %6 : vector<384x64xf32>
    %cst_6 = arith.constant 0.000000e+00 : f32
    %8 = vector.broadcast %cst_6 : f32 to vector<384x64xf32>
    %9 = arith.maximumf %7, %8 : vector<384x64xf32>
    %10 = vector.shape_cast %9 : vector<384x64xf32> to vector<8x48x64xf32>
    %11 = vector.extract_strided_slice %10 {offsets = [0, 0, 0], sizes = [8, 24, 64], strides = [1, 1, 1]} : vector<8x48x64xf32> to vector<8x24x64xf32>
    %12 = vector.extract_strided_slice %10 {offsets = [0, 24, 0], sizes = [8, 24, 64], strides = [1, 1, 1]} : vector<8x48x64xf32> to vector<8x24x64xf32>
    %13 = arith.maximumf %11, %12 : vector<8x24x64xf32>
    %14 = vector.shape_cast %13 : vector<8x24x64xf32> to vector<192x64xf32>
    %15 = arith.truncf %14 : vector<192x64xf32> to vector<192x64xbf16>
    %cst_7 = arith.constant 0.000000e+00 : bf16
    %16 = vector.broadcast %cst_7 : bf16 to vector<24x64xbf16>
    %17 = vector.extract_strided_slice %15 {offsets = [0, 0], sizes = [168, 64], strides = [1, 1]} : vector<192x64xbf16> to vector<168x64xbf16>
    %18 = tpu.concatenate %16, %17 in 0 : vector<24x64xbf16>, vector<168x64xbf16> -> vector<192x64xbf16>
    %19 = vector.extract_strided_slice %15 {offsets = [24, 0], sizes = [168, 64], strides = [1, 1]} : vector<192x64xbf16> to vector<168x64xbf16>
    %20 = tpu.concatenate %19, %16 in 0 : vector<168x64xbf16>, vector<24x64xbf16> -> vector<192x64xbf16>
    %21 = tpu.concatenate %18, %15, %20 in 1 : vector<192x64xbf16>, vector<192x64xbf16>, vector<192x64xbf16> -> vector<192x192xbf16>
    %c0_8 = arith.constant 0 : index
    %c0_9 = arith.constant 0 : index
    %22 = vector.load %arg4[%c0_8, %c0_9] : memref<192x32xbf16, #tpu.memory_space<vmem>>, vector<192x32xbf16>
    %cst_10 = arith.constant dense<0.000000e+00> : vector<192x32xf32>
    %23 = tpu.matmul %21, %22, %cst_10 {dimension_numbers = #tpu.dot_dimension_numbers<[1], [0], [0], [1], [0, 0, 1, 1], [], []>} : vector<192x192xbf16>, vector<192x32xbf16>, vector<192x32xf32> -> vector<192x32xf32>
    %c0_11 = arith.constant 0 : index
    %c0_12 = arith.constant 0 : index
    %24 = vector.load %arg5[%c0_11, %c0_12] : memref<1x32xf32, #tpu.memory_space<vmem>>, vector<1x32xf32>
    %25 = vector.broadcast %24 : vector<1x32xf32> to vector<192x32xf32>
    %26 = arith.addf %23, %25 : vector<192x32xf32>
    %cst_13 = arith.constant 0.000000e+00 : f32
    %27 = vector.broadcast %cst_13 : f32 to vector<192x32xf32>
    %28 = arith.maximumf %26, %27 : vector<192x32xf32>
    %29 = vector.shape_cast %28 : vector<192x32xf32> to vector<4x48x32xf32>
    %30 = vector.extract_strided_slice %29 {offsets = [0, 0, 0], sizes = [4, 24, 32], strides = [1, 1, 1]} : vector<4x48x32xf32> to vector<4x24x32xf32>
    %31 = vector.extract_strided_slice %29 {offsets = [0, 24, 0], sizes = [4, 24, 32], strides = [1, 1, 1]} : vector<4x48x32xf32> to vector<4x24x32xf32>
    %32 = arith.maximumf %30, %31 : vector<4x24x32xf32>
    %33 = vector.extract_strided_slice %32 {offsets = [0, 0, 0], sizes = [1, 24, 32], strides = [1, 1, 1]} : vector<4x24x32xf32> to vector<1x24x32xf32>
    %34 = vector.shape_cast %33 : vector<1x24x32xf32> to vector<24x32xf32>
    %35 = vector.extract_strided_slice %32 {offsets = [1, 0, 0], sizes = [1, 24, 32], strides = [1, 1, 1]} : vector<4x24x32xf32> to vector<1x24x32xf32>
    %36 = vector.shape_cast %35 : vector<1x24x32xf32> to vector<24x32xf32>
    %37 = vector.extract_strided_slice %32 {offsets = [2, 0, 0], sizes = [1, 24, 32], strides = [1, 1, 1]} : vector<4x24x32xf32> to vector<1x24x32xf32>
    %38 = vector.shape_cast %37 : vector<1x24x32xf32> to vector<24x32xf32>
    %39 = vector.extract_strided_slice %32 {offsets = [3, 0, 0], sizes = [1, 24, 32], strides = [1, 1, 1]} : vector<4x24x32xf32> to vector<1x24x32xf32>
    %40 = vector.shape_cast %39 : vector<1x24x32xf32> to vector<24x32xf32>
    %41 = tpu.concatenate %34, %36, %38, %40 in 1 : vector<24x32xf32>, vector<24x32xf32>, vector<24x32xf32>, vector<24x32xf32> -> vector<24x128xf32>
    %42 = arith.truncf %41 : vector<24x128xf32> to vector<24x128xbf16>
    %c0_14 = arith.constant 0 : index
    %c0_15 = arith.constant 0 : index
    %43 = vector.load %arg6[%c0_14, %c0_15] : memref<128x100xbf16, #tpu.memory_space<vmem>>, vector<128x100xbf16>
    %cst_16 = arith.constant dense<0.000000e+00> : vector<24x100xf32>
    %44 = tpu.matmul %42, %43, %cst_16 {dimension_numbers = #tpu.dot_dimension_numbers<[1], [0], [0], [1], [0, 0, 1, 1], [], []>} : vector<24x128xbf16>, vector<128x100xbf16>, vector<24x100xf32> -> vector<24x100xf32>
    %c0_17 = arith.constant 0 : index
    %c0_18 = arith.constant 0 : index
    %45 = vector.load %arg7[%c0_17, %c0_18] : memref<1x100xf32, #tpu.memory_space<vmem>>, vector<1x100xf32>
    %46 = vector.broadcast %45 : vector<1x100xf32> to vector<24x100xf32>
    %47 = arith.addf %44, %46 : vector<24x100xf32>
    %cst_19 = arith.constant 0.000000e+00 : f32
    %48 = vector.broadcast %cst_19 : f32 to vector<24x100xf32>
    %49 = arith.maximumf %47, %48 : vector<24x100xf32>
    %50 = arith.truncf %49 : vector<24x100xf32> to vector<24x100xbf16>
    %c0_20 = arith.constant 0 : index
    %c0_21 = arith.constant 0 : index
    %51 = vector.load %arg8[%c0_20, %c0_21] : memref<100x128xbf16, #tpu.memory_space<vmem>>, vector<100x128xbf16>
    %cst_22 = arith.constant dense<0.000000e+00> : vector<24x128xf32>
    %52 = tpu.matmul %50, %51, %cst_22 {dimension_numbers = #tpu.dot_dimension_numbers<[1], [0], [0], [1], [0, 0, 1, 1], [], []>} : vector<24x100xbf16>, vector<100x128xbf16>, vector<24x128xf32> -> vector<24x128xf32>
    %c0_23 = arith.constant 0 : index
    %c0_24 = arith.constant 0 : index
    %53 = vector.load %arg9[%c0_23, %c0_24] : memref<1x128xf32, #tpu.memory_space<vmem>>, vector<1x128xf32>
    %54 = vector.broadcast %53 : vector<1x128xf32> to vector<24x128xf32>
    %55 = arith.addf %52, %54 : vector<24x128xf32>
    %c0_25 = arith.constant 0 : index
    %c0_26 = arith.constant 0 : index
    %56 = vector.load %arg10[%c0_25, %c0_26] : memref<24x128xf32, #tpu.memory_space<vmem>>, vector<24x128xf32>
    tpu.vector_store %arg10[%c0_25, %c0_26], %55 {strides = array<i32>} : memref<24x128xf32, #tpu.memory_space<vmem>>, vector<24x128xf32>,
    return
  }
  func.func @transform_0(%arg0: i32) -> (i32, i32, i32) {
    %c0_i32 = arith.constant 0 : i32
    %c0_i32_0 = arith.constant 0 : i32
    %c0_i32_1 = arith.constant 0 : i32
    return %c0_i32, %arg0, %c0_i32_0 : i32, i32, i32
  }
  func.func @transform_1(%arg0: i32) -> (i32, i32) {
    %c0_i32 = arith.constant 0 : i32
    %c0_i32_0 = arith.constant 0 : i32
    %c0_i32_1 = arith.constant 0 : i32
    return %c0_i32, %c0_i32_0 : i32, i32
  }
  func.func @transform_2(%arg0: i32) -> (i32, i32) {
    %c0_i32 = arith.constant 0 : i32
    %c0_i32_0 = arith.constant 0 : i32
    %c0_i32_1 = arith.constant 0 : i32
    return %c0_i32, %c0_i32_0 : i32, i32
  }
  func.func @transform_3(%arg0: i32) -> (i32, i32) {
    %c0_i32 = arith.constant 0 : i32
    %c0_i32_0 = arith.constant 0 : i32
    %c0_i32_1 = arith.constant 0 : i32
    return %c0_i32, %c0_i32_0 : i32, i32
  }
  func.func @transform_4(%arg0: i32) -> (i32, i32) {
    %c0_i32 = arith.constant 0 : i32
    %c0_i32_0 = arith.constant 0 : i32
    %c0_i32_1 = arith.constant 0 : i32
    return %c0_i32, %c0_i32_0 : i32, i32
  }
  func.func @transform_5(%arg0: i32) -> (i32, i32) {
    %c0_i32 = arith.constant 0 : i32
    %c0_i32_0 = arith.constant 0 : i32
    %c0_i32_1 = arith.constant 0 : i32
    return %c0_i32, %c0_i32_0 : i32, i32
  }
  func.func @transform_6(%arg0: i32) -> (i32, i32) {
    %c0_i32 = arith.constant 0 : i32
    %c0_i32_0 = arith.constant 0 : i32
    %c0_i32_1 = arith.constant 0 : i32
    return %c0_i32, %c0_i32_0 : i32, i32
  }
  func.func @transform_7(%arg0: i32) -> (i32, i32) {
    %c0_i32 = arith.constant 0 : i32
    %c0_i32_0 = arith.constant 0 : i32
    %c0_i32_1 = arith.constant 0 : i32
    return %c0_i32, %c0_i32_0 : i32, i32
  }
  func.func @transform_8(%arg0: i32) -> (i32, i32) {
    %c0_i32 = arith.constant 0 : i32
    %c0_i32_0 = arith.constant 0 : i32
    %c0_i32_1 = arith.constant 0 : i32
    return %c0_i32, %c0_i32_0 : i32, i32
  }
  func.func @transform_9(%arg0: i32) -> (i32, i32) {
    %c0_i32 = arith.constant 0 : i32
    %c0_i32_0 = arith.constant 0 : i32
    return %arg0, %c0_i32 : i32, i32
  }
}

</mosaic_0001>

<bundles_post_ra>
// kernel: tpu_custom_call.1
= control target key start
LH: loop header
LB: loop body
LE: loop exit
PB: predicated region body
PF: predicated region fallthrough
CT: control target
= control target key end

     0   :  { %vm193_vm0 = vcmask 1045504   ;;  %vm120_vm1 = vcmask 97280   ;;  %s2024_s0 = inlined_call_operand.vmem [shape: f32[16,24,12], index: 0, kind: input, shape index: {}]   ;;  %s2025_s1 = inlined_call_operand.vmem [shape: bf16[12,64], index: 1, kind: input, shape index: {}]   ;;  %s2026_s2 = inlined_call_operand.vmem [shape: f32[1,64], index: 2, kind: input, shape index: {}]   ;;  %s2027_s3 = inlined_call_operand.vmem [shape: bf16[192,32], index: 3, kind: input, shape index: {}]   ;;  %s2028_s4 = inlined_call_operand.vmem [shape: f32[1,32], index: 4, kind: input, shape index: {}]   ;;  %s2029_s5 = inlined_call_operand.vmem [shape: bf16[128,100], index: 5, kind: input, shape index: {}]   ;;  %s2030_s6 = inlined_call_operand.vmem [shape: f32[1,100], index: 6, kind: input, shape index: {}]   ;;  %s2031_s7 = inlined_call_operand.vmem [shape: bf16[100,128], index: 7, kind: input, shape index: {}]   ;;  %s2032_s8 = inlined_call_operand.vmem [shape: f32[1,128], index: 8, kind: input, shape index: {}]   ;;  %s2033_s9 = inlined_call_operand.hbm [shape: f32[24,128], index: 9, kind: output, shape index: {}]  }
   0x1   :  { %v1449_v0 = vld [vmem:[%s2025_s1] sm:$0x3f]   ;;  %v35_v2 = vld [vmem:[%s2024_s0 + $0x8] sm:$0xff]  ;;  %v36_v3 = vld [vmem:[%s2024_s0 + $0x10] sm:$0xff] }
   0x2   :  { %v34_v1 = vld [vmem:[%s2024_s0] sm:$0xff]  ;;  %1425 = vmatprep.subr.msk.bf16.mxu0 %vm193_vm0, %v1449_v0  ;;  %v195_v4 = vsel %vm193_vm0, %v1449_v0, 0  ;;  %v37_v6 = vld [vmem:[%s2024_s0 + $0x18] sm:$0xff]  ;;  %v39_v8 = vld [vmem:[%s2024_s0 + $0x28] sm:$0xff] }
   0x3   :  { %v82_v5 = vpack.c.bf16 %v35_v2, %v34_v1  ;;  %v38_v7 = vld [vmem:[%s2024_s0 + $0x20] sm:$0xff]  ;;  %1338 = vmatpush3.bf16.msra.mxu0 %v195_v4  ;;  %v83_v9 = vpack.c.bf16 %v37_v6, %v36_v3  ;;  %v40_v11 = vld [vmem:[%s2024_s0 + $0x30] sm:$0xff]  ;;  %v41_v12 = vld [vmem:[%s2024_s0 + $0x38] sm:$0xff] }
   0x4   :  { %v84_v10 = vpack.c.bf16 %v39_v8, %v38_v7  ;;  %v42_v13 = vld [vmem:[%s2024_s0 + $0x40] sm:$0xff]  ;;  %v43_v14 = vld [vmem:[%s2024_s0 + $0x48] sm:$0xff]  ;;  %v85_v15 = vpack.c.bf16 %v41_v12, %v40_v11  ;;  %v44_v17 = vld [vmem:[%s2024_s0 + $0x50] sm:$0xff] }
   0x5   :  { %1339 = vmatprep.mubr.msk.bf16.mxu0 %vm120_vm1, %v82_v5  ;;  %v86_v16 = vpack.c.bf16 %v43_v14, %v42_v13  ;;  %v45_v18 = vld [vmem:[%s2024_s0 + $0x58] sm:$0xff]  ;;  %v46_v19 = vld [vmem:[%s2024_s0 + $0x60] sm:$0xff]  ;;  %v47_v20 = vld [vmem:[%s2024_s0 + $0x68] sm:$0xff] }
   0x6   :  { %1340 = vmatmul.mubr.msk.bf16.vlgmr.msra.gmra.mrb[0].mxu0 %vm120_vm1, %v83_v9  ;;  %v87_v21 = vpack.c.bf16 %v45_v18, %v44_v17  ;;  %v88_v22 = vpack.c.bf16 %v47_v20, %v46_v19  ;;  %v48_v23 = vld [vmem:[%s2024_s0 + $0x70] sm:$0xff]  ;;  %v49_v24 = vld [vmem:[%s2024_s0 + $0x78] sm:$0xff]  ;;  %v50_v25 = vld [vmem:[%s2024_s0 + $0x80] sm:$0xff] }
   0x7   :  { %1343 = vmatprep.mubr.msk.bf16.mxu0 %vm120_vm1, %v84_v10  ;;  %v51_v26 = vld [vmem:[%s2024_s0 + $0x88] sm:$0xff]  ;;  %v89_v27 = vpack.c.bf16 %v49_v24, %v48_v23  ;;  %v52_v29 = vld [vmem:[%s2024_s0 + $0x90] sm:$0xff]  ;;  %v53_v30 = vld [vmem:[%s2024_s0 + $0x98] sm:$0xff] }
   0x8   :  { %v90_v28 = vpack.c.bf16 %v51_v26, %v50_v25  ;;  %v54_v31 = vld [vmem:[%s2024_s0 + $0xa0] sm:$0xff]  ;;  %v55_v32 = vld [vmem:[%s2024_s0 + $0xa8] sm:$0xff]  ;;  %v91_v33 = vpack.c.bf16 %v53_v30, %v52_v29 }
   0xe   :  { %1344 = vmatmul.mubr.msk.bf16.gmra.mrb[4].mxu0 %vm120_vm1, %v85_v15 }
   0xf   :  { %1347 = vmatprep.mubr.msk.bf16.mxu0 %vm120_vm1, %v86_v16 }
  0x16   :  { %1348 = vmatmul.mubr.msk.bf16.gmra.mrb[8].mxu0 %vm120_vm1, %v87_v21 }
  0x17   :  { %1351 = vmatprep.mubr.msk.bf16.mxu0 %vm120_vm1, %v88_v22 }
  0x1e   :  { %1352 = vmatmul.mubr.msk.bf16.gmra.mrb[12].mxu0 %vm120_vm1, %v89_v27 }
  0x1f   :  { %1355 = vmatprep.mubr.msk.bf16.mxu0 %vm120_vm1, %v90_v28 }
  0x20   :  { %14 = vsyncpa [#allocation3], 0  ;;  %v92_v34 = vpack.c.bf16 %v55_v32, %v54_v31  ;;  %v56_v35 = vld [vmem:[%s2024_s0 + $0xb0] sm:$0xff]  ;;  %v57_v36 = vld [vmem:[%s2024_s0 + $0xb8] sm:$0xff]  ;;  %v1501_v11 = vmov 0   ;;  %vm572_vm2 = vcmask 523264  }
  0x21   :  { %v58_v37 = vld [vmem:[%s2024_s0 + $0xc0] sm:$0xff]  ;;  %v59_v38 = vld [vmem:[%s2024_s0 + $0xc8] sm:$0xff]  ;;  %v93_v39 = vpack.c.bf16 %v57_v36, %v56_v35  ;;  %v60_v41 = vld [vmem:[%s2024_s0 + $0xd0] sm:$0xff]  ;;  %747 = vmatprep.subr.bf16.mxu1 %v1501_v11  ;;  %vm517_vm3 = vcmask 1043456   ;;  %s1503_s11 = smov 32   ;;  %s1504_s17 = smov 96  }
  0x22   :  { %v94_v40 = vpack.c.bf16 %v59_v38, %v58_v37  ;;  %v61_v42 = vld [vmem:[%s2024_s0 + $0xd8] sm:$0xff]  ;;  %v62_v43 = vld [vmem:[%s2024_s0 + $0xe0] sm:$0xff]  ;;  %v63_v44 = vld [vmem:[%s2024_s0 + $0xe8] sm:$0xff]  ;;  %vm948_vm5 = vcmask 261120   ;;  %vm955_vm6 = vcmask 785408   ;;  %vm1151_vm7 = vcmask 1041408  }
  0x23   :  { %v95_v45 = vpack.c.bf16 %v61_v42, %v60_v41  ;;  %v96_v46 = vpack.c.bf16 %v63_v44, %v62_v43  ;;  %v64_v47 = vld [vmem:[%s2024_s0 + $0xf0] sm:$0xff]  ;;  %v65_v48 = vld [vmem:[%s2024_s0 + $0xf8] sm:$0xff]  ;;  %v66_v49 = vld [vmem:[%s2024_s0 + $0x100] sm:$0xff]  ;;  %vm1144_vm8 = vcmask 818176  }
  0x24   :  { %v67_v50 = vld [vmem:[%s2024_s0 + $0x108] sm:$0xff]  ;;  %v97_v51 = vpack.c.bf16 %v65_v48, %v64_v47  ;;  %v68_v53 = vld [vmem:[%s2024_s0 + $0x110] sm:$0xff]  ;;  %v69_v54 = vld [vmem:[%s2024_s0 + $0x118] sm:$0xff] }
  0x25   :  { %v98_v52 = vpack.c.bf16 %v67_v50, %v66_v49  ;;  %v70_v55 = vld [vmem:[%s2024_s0 + $0x120] sm:$0xff]  ;;  %v71_v56 = vld [vmem:[%s2024_s0 + $0x128] sm:$0xff]  ;;  %v99_v57 = vpack.c.bf16 %v69_v54, %v68_v53  ;;  %v72_v59 = vld [vmem:[%s2024_s0 + $0x130] sm:$0xff] }
  0x26   :  { %1356 = vmatmul.mubr.msk.bf16.gmra.mrb[16].mxu0 %vm120_vm1, %v91_v33  ;;  %v100_v58 = vpack.c.bf16 %v71_v56, %v70_v55  ;;  %v73_v60 = vld [vmem:[%s2024_s0 + $0x138] sm:$0xff]  ;;  %v74_v61 = vld [vmem:[%s2024_s0 + $0x140] sm:$0xff]  ;;  %v75_v62 = vld [vmem:[%s2024_s0 + $0x148] sm:$0xff] }
  0x27   :  { %1359 = vmatprep.mubr.msk.bf16.mxu0 %vm120_vm1, %v92_v34  ;;  %v101_v63 = vpack.c.bf16 %v73_v60, %v72_v59  ;;  %v102_v0 = vpack.c.bf16 %v75_v62, %v74_v61  ;;  %v76_v1 = vld [vmem:[%s2024_s0 + $0x150] sm:$0xff]  ;;  %v77_v2 = vld [vmem:[%s2024_s0 + $0x158] sm:$0xff]  ;;  %v78_v3 = vld [vmem:[%s2024_s0 + $0x160] sm:$0xff] }
  0x28   :  { %v79_v4 = vld [vmem:[%s2024_s0 + $0x168] sm:$0xff]  ;;  %v103_v5 = vpack.c.bf16 %v77_v2, %v76_v1  ;;  %v80_v7 = vld [vmem:[%s2024_s0 + $0x170] sm:$0xff]  ;;  %v81_v8 = vld [vmem:[%s2024_s0 + $0x178] sm:$0xff] }
  0x29   :  { %v104_v6 = vpack.c.bf16 %v79_v4, %v78_v3  ;;  %v105_v9 = vpack.c.bf16 %v81_v8, %v80_v7  ;;  %v1450_v10 = vld [vmem:[%s2027_s3] sm:$0xff]   ;;  %v1451_v12 = vld [vmem:[%s2027_s3 + $0x8] sm:$0xff]   ;;  %v1452_v13 = vld [vmem:[%s2027_s3 + $0x10] sm:$0xff]  }
  0x2a   :  { %748 = vmatpush1.bf16.msra.mxu1 %v1450_v10  ;;  %v1453_v14 = vld [vmem:[%s2027_s3 + $0x18] sm:$0xff]   ;;  %v1454_v15 = vld [vmem:[%s2027_s3 + $0x20] sm:$0xff]   ;;  %v1455_v16 = vld [vmem:[%s2027_s3 + $0x28] sm:$0xff]  }
  0x2b   :  { %749 = vmatprep.subr.bf16.mxu1 %v1501_v11  ;;  %v1456_v17 = vld [vmem:[%s2027_s3 + $0x30] sm:$0xff]   ;;  %v1457_v18 = vld [vmem:[%s2027_s3 + $0x38] sm:$0xff]   ;;  %v1458_v19 = vld [vmem:[%s2027_s3 + $0x40] sm:$0xff]  }
  0x2c   :  { %v1459_v20 = vld [vmem:[%s2027_s3 + $0x48] sm:$0xff]   ;;  %v1460_v21 = vld [vmem:[%s2027_s3 + $0x50] sm:$0xff]   ;;  %v1461_v22 = vld [vmem:[%s2027_s3 + $0x58] sm:$0xff]  }
  0x2d   :  { %v1779_v23 = vld [vmem:[%s2026_s2] ss:$0 sm:$0xff]  ;;  %s1502_s2 = smov 64   ;;  %vm1262_vm4 = vmneg %vm572_vm2 }
  0x2e   :  { %1360 = vmatmul.mubr.msk.bf16.gmra.mrb[20].mxu0 %vm120_vm1, %v93_v39  ;;  %750 = vmatpush1.bf16.msra.mxu1 %v1451_v12 }
  0x2f   :  { %1363 = vmatprep.mubr.msk.bf16.mxu0 %vm120_vm1, %v94_v40  ;;  %751 = vmatprep.subr.bf16.mxu1 %v1501_v11 }
  0x32   :  { %752 = vmatpush1.bf16.msra.mxu1 %v1452_v13 }
  0x33   :  { %753 = vmatprep.subr.bf16.mxu1 %v1501_v11 }
  0x36   :  { %1364 = vmatmul.mubr.msk.bf16.gmra.mrb[24].mxu0 %vm120_vm1, %v95_v45  ;;  %754 = vmatpush1.bf16.msra.mxu1 %v1453_v14 }
  0x37   :  { %1367 = vmatprep.mubr.msk.bf16.mxu0 %vm120_vm1, %v96_v46  ;;  %755 = vmatprep.subr.bf16.mxu1 %v1501_v11 }
  0x3a   :  { %756 = vmatpush1.bf16.msra.mxu1 %v1454_v15 }
  0x3b   :  { %757 = vmatprep.subr.bf16.mxu1 %v1501_v11 }
  0x3e   :  { %1368 = vmatmul.mubr.msk.bf16.gmra.mrb[28].mxu0 %vm120_vm1, %v97_v51  ;;  %758 = vmatpush1.bf16.msra.mxu1 %v1455_v16 }
  0x3f   :  { %1371 = vmatprep.mubr.msk.bf16.mxu0 %vm120_vm1, %v98_v52  ;;  %759 = vmatprep.subr.bf16.mxu1 %v1501_v11 }
  0x42   :  { %760 = vmatpush1.bf16.msra.mxu1 %v1456_v17 }
  0x43   :  { %761 = vmatprep.subr.bf16.mxu1 %v1501_v11 }
  0x46   :  { %1372 = vmatmul.mubr.msk.bf16.gmra.mrb[32].mxu0 %vm120_vm1, %v99_v57  ;;  %762 = vmatpush1.bf16.msra.mxu1 %v1457_v18 }
  0x47   :  { %1375 = vmatprep.mubr.msk.bf16.mxu0 %vm120_vm1, %v100_v58  ;;  %763 = vmatprep.subr.bf16.mxu1 %v1501_v11 }
  0x4a   :  { %764 = vmatpush1.bf16.msra.mxu1 %v1458_v19 }
  0x4b   :  { %765 = vmatprep.subr.bf16.mxu1 %v1501_v11 }
  0x4e   :  { %1376 = vmatmul.mubr.msk.bf16.gmra.mrb[36].mxu0 %vm120_vm1, %v101_v63  ;;  %766 = vmatpush1.bf16.msra.mxu1 %v1459_v20 }
  0x4f   :  { %1379 = vmatprep.mubr.msk.bf16.mxu0 %vm120_vm1, %v102_v0  ;;  %767 = vmatprep.subr.bf16.mxu1 %v1501_v11 }
  0x52   :  { %768 = vmatpush1.bf16.msra.mxu1 %v1460_v21 }
  0x53   :  { %769 = vmatprep.subr.bf16.mxu1 %v1501_v11 }
  0x56   :  { %1380 = vmatmul.mubr.msk.bf16.gmra.mrb[40].mxu0 %vm120_vm1, %v103_v5  ;;  %770 = vmatpush1.bf16.msra.mxu1 %v1461_v22 }
  0x57   :  { %1383 = vmatprep.mubr.msk.bf16.mxu0 %vm120_vm1, %v104_v6 }
  0x5e   :  { %1384 = vmatmul.mubr.msk.bf16.gmra.mrb[44].mxu0 %vm120_vm1, %v105_v9 }
  0xd9   :  { %v1341_v24 = vpop.f32.mrb[0].mxu0 }
  0xda   :  { %v231_v25 = vpop.f32.mrb[1].mxu0  ;;  %v240_v36 = vadd.f32 %v1341_v24, %v1779_v23 }
  0xdb   :  { %v232_v26 = vadd.f32 %v1779_v23, %v231_v25  ;;  %v1342_v27 = vpop.f32.mrb[2].mxu0 }
  0xdc   :  { %v243_v28 = vadd.f32 %v1342_v27, %v1779_v23  ;;  %v234_v29 = vpop.f32.mrb[3].mxu0  ;;  %v424_v43 = vmax.f32 %v240_v36, 0.0 }
  0xdd   :  { %v422_v30 = vmax.f32 %v232_v26, 0.0  ;;  %v235_v33 = vadd.f32 %v1779_v23, %v234_v29 }
  0xde   :  { %v425_v31 = vmax.f32 %v243_v28, 0.0 }
  0xdf   :  { %v423_v40 = vmax.f32 %v235_v33, 0.0 }
  0xe0   :  { %v470_v32 = vmax.f32 %v422_v30, %v425_v31 }
  0xe1   :  { %v1345_v34 = vpop.f32.mrb[4].mxu0 }
  0xe2   :  { %v247_v35 = vpop.f32.mrb[5].mxu0  ;;  %v256_v52 = vadd.f32 %v1345_v34, %v1779_v23 }
  0xe3   :  { %v248_v37 = vadd.f32 %v1779_v23, %v247_v35  ;;  %v1346_v38 = vpop.f32.mrb[6].mxu0 }
  0xe4   :  { %v250_v39 = vpop.f32.mrb[7].mxu0  ;;  %v259_v46 = vadd.f32 %v1346_v38, %v1779_v23  ;;  %v428_v63 = vmax.f32 %v256_v52, 0.0 }
  0xe5   :  { %v426_v41 = vmax.f32 %v248_v37, 0.0  ;;  %v251_v42 = vadd.f32 %v1779_v23, %v250_v39 }
  0xe6   :  { %v429_v55 = vmax.f32 %v259_v46, 0.0 }
  0xe7   :  { %v471_v44 = vmax.f32 %v423_v40, %v426_v41  ;;  %v427_v45 = vmax.f32 %v251_v42, 0.0 }
  0xe9   :  { %v472_v47 = vmax.f32 %v424_v43, %v427_v45  ;;  %v1349_v48 = vpop.f32.mrb[8].mxu0  ;;  %v1789_v49 = vpack.c.bf16 %v471_v44, %v470_v32 }
  0xea   :  { %v272_v50 = vadd.f32 %v1349_v48, %v1779_v23  ;;  %v263_v51 = vpop.f32.mrb[9].mxu0 }
  0xeb   :  { %v264_v53 = vadd.f32 %v1779_v23, %v263_v51  ;;  %v1350_v54 = vpop.f32.mrb[10].mxu0  ;;  %548 = vrot.lane.b32.xlu0 %v1789_v49, %s1502_s2  ;;  %v518_v13 = vrot.slane %v1789_v49, 4 }
  0xec   :  { %v432_v56 = vmax.f32 %v272_v50, 0.0  ;;  %v275_v57 = vadd.f32 %v1350_v54, %v1779_v23  ;;  %v266_v58 = vpop.f32.mrb[11].mxu0 }
  0xed   :  { %v430_v59 = vmax.f32 %v264_v53, 0.0  ;;  %v267_v60 = vadd.f32 %v1779_v23, %v266_v58 }
  0xee   :  { %v474_v61 = vmax.f32 %v429_v55, %v432_v56  ;;  %v433_v62 = vmax.f32 %v275_v57, 0.0 }
  0xef   :  { %v431_v0 = vmax.f32 %v267_v60, 0.0 }
  0xf0   :  { %v475_v1 = vmax.f32 %v430_v59, %v433_v62 }
  0xf1   :  { %v473_v2 = vmax.f32 %v428_v63, %v431_v0  ;;  %v1353_v3 = vpop.f32.mrb[12].mxu0 }
  0xf2   :  { %v279_v4 = vpop.f32.mrb[13].mxu0  ;;  %v496_v5 = vpack.c.bf16 %v475_v1, %v474_v61  ;;  %v288_v24 = vadd.f32 %v1353_v3, %v1779_v23 }
  0xf3   :  { %v280_v6 = vadd.f32 %v1779_v23, %v279_v4  ;;  %v1354_v7 = vpop.f32.mrb[14].mxu0  ;;  %v495_v8 = vpack.c.bf16 %v473_v2, %v472_v47 }
  0xf4   :  { %v291_v9 = vadd.f32 %v1354_v7, %v1779_v23  ;;  %v282_v10 = vpop.f32.mrb[15].mxu0  ;;  %552 = vrot.lane.b32.xlu1 %v496_v5, %s1502_s2  ;;  %v521_v12 = vrot.slane %v496_v5, 4  ;;  %v436_v31 = vmax.f32 %v288_v24, 0.0 }
  0xf5   :  { %v434_v14 = vmax.f32 %v280_v6, 0.0  ;;  %550 = vrot.lane.b32.xlu0 %v495_v8, %s1502_s2  ;;  %v519_v15 = vrot.slane %v495_v8, 4  ;;  %v283_v20 = vadd.f32 %v1779_v23, %v282_v10 }
  0xf6   :  { %v437_v16 = vmax.f32 %v291_v9, 0.0 }
  0xf7   :  { %v1804_v17 = vsel %vm517_vm3, %v519_v15, %v521_v12  ;;  %v1809_v18 = vsel %vm517_vm3, %v518_v13, %v519_v15  ;;  %v435_v28 = vmax.f32 %v283_v20, 0.0 }
  0xf8   :  { %v476_v19 = vmax.f32 %v434_v14, %v437_v16  ;;  %1261 = vmatprep.mubr.msk.bf16.mxu1 %vm572_vm2, %v1804_v17 }
  0xf9   :  { %v1357_v21 = vpop.f32.mrb[16].mxu0 }
  0xfa   :  { %v295_v22 = vpop.f32.mrb[17].mxu0  ;;  %v304_v40 = vadd.f32 %v1357_v21, %v1779_v23 }
  0xfb   :  { %v296_v25 = vadd.f32 %v1779_v23, %v295_v22  ;;  %v1358_v26 = vpop.f32.mrb[18].mxu0 }
  0xfc   :  { %v298_v27 = vpop.f32.mrb[19].mxu0  ;;  %v307_v34 = vadd.f32 %v1358_v26, %v1779_v23  ;;  %v440_v54 = vmax.f32 %v304_v40, 0.0 }
  0xfd   :  { %v438_v29 = vmax.f32 %v296_v25, 0.0  ;;  %v299_v30 = vadd.f32 %v1779_v23, %v298_v27 }
  0xfe   :  { %v441_v44 = vmax.f32 %v307_v34, 0.0 }
  0xff   :  { %v477_v32 = vmax.f32 %v435_v28, %v438_v29  ;;  %v439_v33 = vmax.f32 %v299_v30, 0.0 }
 0x101   :  { %v478_v35 = vmax.f32 %v436_v31, %v439_v33  ;;  %v1361_v36 = vpop.f32.mrb[20].mxu0  ;;  %v497_v37 = vpack.c.bf16 %v477_v32, %v476_v19 }
 0x102   :  { %v320_v38 = vadd.f32 %v1361_v36, %v1779_v23  ;;  %v311_v39 = vpop.f32.mrb[21].mxu0 }
 0x103   :  { %v312_v41 = vadd.f32 %v1779_v23, %v311_v39  ;;  %v1362_v42 = vpop.f32.mrb[22].mxu0  ;;  %v523_v43 = vrot.slane %v497_v37, 4  ;;  %554 = vrot.lane.b32.xlu1 %v497_v37, %s1502_s2 }
 0x104   :  { %v444_v45 = vmax.f32 %v320_v38, 0.0  ;;  %v323_v46 = vadd.f32 %v1362_v42, %v1779_v23  ;;  %v314_v47 = vpop.f32.mrb[23].mxu0 }
 0x105   :  { %v442_v48 = vmax.f32 %v312_v41, 0.0  ;;  %v315_v50 = vadd.f32 %v1779_v23, %v314_v47  ;;  %v1825_v51 = vsel %vm517_vm3, %v521_v12, %v523_v43 }
 0x106   :  { %v480_v52 = vmax.f32 %v441_v44, %v444_v45  ;;  %v445_v53 = vmax.f32 %v323_v46, 0.0 }
 0x107   :  { %v443_v55 = vmax.f32 %v315_v50, 0.0 }
 0x108   :  { %v481_v56 = vmax.f32 %v442_v48, %v445_v53 }
 0x109   :  { %v479_v57 = vmax.f32 %v440_v54, %v443_v55  ;;  %v1365_v58 = vpop.f32.mrb[24].mxu0 }
 0x10a   :  { %v327_v59 = vpop.f32.mrb[25].mxu0  ;;  %v499_v60 = vpack.c.bf16 %v481_v56, %v480_v52  ;;  %v336_v14 = vadd.f32 %v1365_v58, %v1779_v23 }
 0x10b   :  { %v328_v61 = vadd.f32 %v1779_v23, %v327_v59  ;;  %v1366_v62 = vpop.f32.mrb[26].mxu0  ;;  %v498_v63 = vpack.c.bf16 %v479_v57, %v478_v35 }
 0x10c   :  { %v339_v0 = vadd.f32 %v1366_v62, %v1779_v23  ;;  %v330_v1 = vpop.f32.mrb[27].mxu0  ;;  %v527_v2 = vrot.slane %v499_v60, 4  ;;  %558 = vrot.lane.b32.xlu1 %v499_v60, %s1502_s2  ;;  %v448_v24 = vmax.f32 %v336_v14, 0.0 }
 0x10d   :  { %v446_v3 = vmax.f32 %v328_v61, 0.0  ;;  %v525_v4 = vrot.slane %v498_v63, 4  ;;  %556 = vrot.lane.b32.xlu0 %v498_v63, %s1502_s2  ;;  %v331_v9 = vadd.f32 %v1779_v23, %v330_v1 }
 0x10e   :  { %v449_v5 = vmax.f32 %v339_v0, 0.0 }
 0x10f   :  { %v1832_v6 = vsel %vm517_vm3, %v523_v43, %v525_v4  ;;  %v1835_v7 = vsel %vm517_vm3, %v525_v4, %v527_v2  ;;  %v447_v20 = vmax.f32 %v331_v9, 0.0 }
 0x110   :  { %v482_v8 = vmax.f32 %v446_v3, %v449_v5 }
 0x111   :  { %v1369_v10 = vpop.f32.mrb[28].mxu0 }
 0x112   :  { %v343_v12 = vpop.f32.mrb[29].mxu0  ;;  %v352_v33 = vadd.f32 %v1369_v10, %v1779_v23 }
 0x113   :  { %v344_v15 = vadd.f32 %v1779_v23, %v343_v12  ;;  %v1370_v16 = vpop.f32.mrb[30].mxu0 }
 0x114   :  { %v346_v19 = vpop.f32.mrb[31].mxu0  ;;  %v355_v27 = vadd.f32 %v1370_v16, %v1779_v23  ;;  %v452_v46 = vmax.f32 %v352_v33, 0.0 }
 0x115   :  { %v450_v21 = vmax.f32 %v344_v15, 0.0  ;;  %v347_v22 = vadd.f32 %v1779_v23, %v346_v19 }
 0x116   :  { %v453_v37 = vmax.f32 %v355_v27, 0.0 }
 0x117   :  { %v483_v25 = vmax.f32 %v447_v20, %v450_v21  ;;  %v451_v26 = vmax.f32 %v347_v22, 0.0 }
 0x119   :  { %v484_v28 = vmax.f32 %v448_v24, %v451_v26  ;;  %v1373_v29 = vpop.f32.mrb[32].mxu0  ;;  %v500_v30 = vpack.c.bf16 %v483_v25, %v482_v8 }
 0x11a   :  { %v368_v31 = vadd.f32 %v1373_v29, %v1779_v23  ;;  %v359_v32 = vpop.f32.mrb[33].mxu0 }
 0x11b   :  { %v360_v34 = vadd.f32 %v1779_v23, %v359_v32  ;;  %v1374_v35 = vpop.f32.mrb[34].mxu0  ;;  %v529_v36 = vrot.slane %v500_v30, 4  ;;  %560 = vrot.lane.b32.xlu0 %v500_v30, %s1502_s2 }
 0x11c   :  { %v456_v38 = vmax.f32 %v368_v31, 0.0  ;;  %v371_v39 = vadd.f32 %v1374_v35, %v1779_v23  ;;  %v362_v40 = vpop.f32.mrb[35].mxu0 }
 0x11d   :  { %v454_v41 = vmax.f32 %v360_v34, 0.0  ;;  %v363_v42 = vadd.f32 %v1779_v23, %v362_v40  ;;  %v1849_v43 = vsel %vm517_vm3, %v527_v2, %v529_v36 }
 0x11e   :  { %v486_v44 = vmax.f32 %v453_v37, %v456_v38  ;;  %v457_v45 = vmax.f32 %v371_v39, 0.0 }
 0x11f   :  { %v455_v47 = vmax.f32 %v363_v42, 0.0 }
 0x120   :  { %v487_v48 = vmax.f32 %v454_v41, %v457_v45 }
 0x121   :  { %v485_v50 = vmax.f32 %v452_v46, %v455_v47  ;;  %v1377_v52 = vpop.f32.mrb[36].mxu0 }
 0x122   :  { %v375_v53 = vpop.f32.mrb[37].mxu0  ;;  %v502_v54 = vpack.c.bf16 %v487_v48, %v486_v44  ;;  %v384_v8 = vadd.f32 %v1377_v52, %v1779_v23 }
 0x123   :  { %v376_v55 = vadd.f32 %v1779_v23, %v375_v53  ;;  %v1378_v56 = vpop.f32.mrb[38].mxu0  ;;  %v501_v57 = vpack.c.bf16 %v485_v50, %v484_v28 }
 0x124   :  { %v387_v58 = vadd.f32 %v1378_v56, %v1779_v23  ;;  %v378_v59 = vpop.f32.mrb[39].mxu0  ;;  %v533_v60 = vrot.slane %v502_v54, 4  ;;  %564 = vrot.lane.b32.xlu0 %v502_v54, %s1502_s2  ;;  %v460_v19 = vmax.f32 %v384_v8, 0.0  ;;  %v542_v56 = vsel %vm517_vm3, 0, %v518_v13 }
 0x125   :  { %v458_v61 = vmax.f32 %v376_v55, 0.0  ;;  %v531_v62 = vrot.slane %v501_v57, 4  ;;  %562 = vrot.lane.b32.xlu1 %v501_v57, %s1502_s2  ;;  %v379_v3 = vadd.f32 %v1779_v23, %v378_v59 }
 0x126   :  { %v461_v63 = vmax.f32 %v387_v58, 0.0 }
 0x127   :  { %v1856_v0 = vsel %vm517_vm3, %v529_v36, %v531_v62  ;;  %v1859_v1 = vsel %vm517_vm3, %v531_v62, %v533_v60  ;;  %v459_v14 = vmax.f32 %v379_v3, 0.0 }
 0x128   :  { %v488_v2 = vmax.f32 %v458_v61, %v461_v63 }
 0x129   :  { %v1381_v4 = vpop.f32.mrb[40].mxu0 }
 0x12a   :  { %v391_v5 = vpop.f32.mrb[41].mxu0  ;;  %v400_v29 = vadd.f32 %v1381_v4, %v1779_v23 }
 0x12b   :  { %v392_v9 = vadd.f32 %v1779_v23, %v391_v5  ;;  %v1382_v10 = vpop.f32.mrb[42].mxu0 }
 0x12c   :  { %v394_v12 = vpop.f32.mrb[43].mxu0  ;;  %v403_v22 = vadd.f32 %v1382_v10, %v1779_v23  ;;  %v464_v42 = vmax.f32 %v400_v29, 0.0  ;;  %v1462_v10 = vld [vmem:[%s2029_s5] sm:$0xff]  }
 0x12d   :  { %v462_v15 = vmax.f32 %v392_v9, 0.0  ;;  %v395_v16 = vadd.f32 %v1779_v23, %v394_v12  ;;  %1387 = vmatprep.subr.bf16.mxu0 %v1462_v10  ;;  %v1464_v12 = vld [vmem:[%s2029_s5 + $0x10] sm:$0xff]  }
 0x12e   :  { %v465_v33 = vmax.f32 %v403_v22, 0.0  ;;  %1388 = vmatpush3.bf16.msra.mxu0 %v1462_v10 }
 0x12f   :  { %v489_v20 = vmax.f32 %v459_v14, %v462_v15  ;;  %v463_v21 = vmax.f32 %v395_v16, 0.0 }
 0x131   :  { %v490_v24 = vmax.f32 %v460_v19, %v463_v21  ;;  %v1385_v25 = vpop.f32.mrb[44].mxu0  ;;  %v503_v26 = vpack.c.bf16 %v489_v20, %v488_v2  ;;  %v1933_v20 = vld [vmem:[%s2028_s4] ss:$0 sm:$0xff] }
 0x132   :  { %v416_v27 = vadd.f32 %v1385_v25, %v1779_v23  ;;  %v407_v28 = vpop.f32.mrb[45].mxu0 }
 0x133   :  { %v408_v30 = vadd.f32 %v1779_v23, %v407_v28  ;;  %v1386_v31 = vpop.f32.mrb[46].mxu0  ;;  %v535_v32 = vrot.slane %v503_v26, 4  ;;  %566 = vrot.lane.b32.xlu1 %v503_v26, %s1502_s2 }
 0x134   :  { %v468_v34 = vmax.f32 %v416_v27, 0.0  ;;  %v419_v35 = vadd.f32 %v1386_v31, %v1779_v23  ;;  %v410_v36 = vpop.f32.mrb[47].mxu0 }
 0x135   :  { %v466_v37 = vmax.f32 %v408_v30, 0.0  ;;  %v411_v38 = vadd.f32 %v1779_v23, %v410_v36  ;;  %v536_v39 = vsel %vm517_vm3, %v533_v60, %v535_v32 }
 0x136   :  { %v492_v40 = vmax.f32 %v465_v33, %v468_v34  ;;  %v469_v41 = vmax.f32 %v419_v35, 0.0 }
 0x137   :  { %v467_v44 = vmax.f32 %v411_v38, 0.0 }
 0x138   :  { %v493_v45 = vmax.f32 %v466_v37, %v469_v41 }
 0x139   :  { %v491_v46 = vmax.f32 %v464_v42, %v467_v44 }
 0x13a   :  { %v505_v47 = vpack.c.bf16 %v493_v45, %v492_v40 }
 0x13b   :  { %v504_v48 = vpack.c.bf16 %v491_v46, %v490_v24 }
 0x13c   :  { %v544_v50 = vrot.slane %v505_v47, 4  ;;  %570 = vrot.lane.b32.xlu1 %v505_v47, %s1502_s2 }
 0x13d   :  { %v537_v52 = vrot.slane %v504_v48, 4  ;;  %568 = vrot.lane.b32.xlu0 %v504_v48, %s1502_s2 }
 0x13e   :  { %v547_v5 = vsel %vm517_vm3, %v544_v50, 0 }
 0x13f   :  { %v538_v53 = vsel %vm517_vm3, %v535_v32, %v537_v52  ;;  %v545_v23 = vsel %vm517_vm3, %v537_v52, %v544_v50 }
 0x15d   :  { %v549_v54 = vpop.permute.xlu0 %548 }
 0x15e   :  { %1263 = vmatmul.mubr.msk.bf16.vlgmr.msra.gmra.mrb[0].mxu1 %vm1262_vm4, %v549_v54 }
 0x15f   :  { %1264 = vmatprep.mubr.msk.bf16.mxu1 %vm572_vm2, %v1825_v51 }
 0x166   :  { %v553_v58 = vpop.permute.xlu1 %552 }
 0x167   :  { %v551_v55 = vpop.permute.xlu0 %550  ;;  %v581_v59 = vsel %vm572_vm2, %v1809_v18, %v553_v58 }
 0x168   :  { %v577_v57 = vsel %vm572_vm2, %v542_v56, %v551_v55 }
 0x169   :  { %788 = vmatmul.mubr.bf16.gmra.mrb[4].mxu1 %v577_v57 }
 0x16a   :  { %1265 = vmatprep.mubr.msk.bf16.mxu1 %vm572_vm2, %v1832_v6 }
 0x171   :  { %796 = vmatmul.mubr.bf16.gmra.mrb[8].mxu1 %v581_v59  ;;  %v1466_v59 = vld [vmem:[%s2029_s5 + $0x20] sm:$0xff]  }
 0x172   :  { %1266 = vmatprep.mubr.msk.bf16.mxu1 %vm572_vm2, %v1835_v7 }
 0x175   :  { %v555_v60 = vpop.permute.xlu1 %554 }
 0x176   :  { %v585_v49 = vsel %vm572_vm2, %v1804_v17, %v555_v60  ;;  %v1467_v60 = vld [vmem:[%s2029_s5 + $0x28] sm:$0xff]  }
 0x179   :  { %804 = vmatmul.mubr.bf16.gmra.mrb[12].mxu1 %v585_v49 }
 0x17a   :  { %1267 = vmatprep.mubr.msk.bf16.mxu1 %vm572_vm2, %v1849_v43 }
 0x17e   :  { %v559_v18 = vpop.permute.xlu1 %558 }
 0x17f   :  { %v557_v13 = vpop.permute.xlu0 %556  ;;  %v593_v62 = vsel %vm572_vm2, %v1832_v6, %v559_v18 }
 0x180   :  { %v589_v61 = vsel %vm572_vm2, %v1825_v51, %v557_v13 }
 0x181   :  { %812 = vmatmul.mubr.bf16.gmra.mrb[16].mxu1 %v589_v61 }
 0x182   :  { %1268 = vmatprep.mubr.msk.bf16.mxu1 %vm572_vm2, %v1856_v0 }
 0x189   :  { %820 = vmatmul.mubr.bf16.gmra.mrb[20].mxu1 %v593_v62 }
 0x18a   :  { %1269 = vmatprep.mubr.msk.bf16.mxu1 %vm572_vm2, %v1859_v1 }
 0x18d   :  { %v561_v17 = vpop.permute.xlu0 %560 }
 0x18e   :  { %v597_v63 = vsel %vm572_vm2, %v1835_v7, %v561_v17 }
 0x191   :  { %828 = vmatmul.mubr.bf16.gmra.mrb[24].mxu1 %v597_v63 }
 0x192   :  { %1270 = vmatprep.mubr.msk.bf16.mxu1 %vm572_vm2, %v536_v39 }
 0x196   :  { %v565_v3 = vpop.permute.xlu0 %564 }
 0x197   :  { %v563_v51 = vpop.permute.xlu1 %562  ;;  %v605_v6 = vsel %vm572_vm2, %v1856_v0, %v565_v3 }
 0x198   :  { %v601_v2 = vsel %vm572_vm2, %v1849_v43, %v563_v51 }
 0x199   :  { %836 = vmatmul.mubr.bf16.gmra.mrb[28].mxu1 %v601_v2 }
 0x19a   :  { %1271 = vmatprep.mubr.msk.bf16.mxu1 %vm572_vm2, %v538_v53 }
 0x1a1   :  { %844 = vmatmul.mubr.bf16.gmra.mrb[32].mxu1 %v605_v6 }
 0x1a2   :  { %1272 = vmatprep.mubr.msk.bf16.mxu1 %vm572_vm2, %v545_v23 }
 0x1a5   :  { %v567_v4 = vpop.permute.xlu1 %566 }
 0x1a6   :  { %v609_v7 = vsel %vm572_vm2, %v1859_v1, %v567_v4  ;;  %v1463_v1 = vld [vmem:[%s2029_s5 + $0x8] sm:$0xff]  }
 0x1a7   :  { %1389 = vmatprep.subr.bf16.mxu0 %v1463_v1 }
 0x1a8   :  { %1390 = vmatpush3.bf16.msra.mxu0 %v1463_v1 }
 0x1a9   :  { %852 = vmatmul.mubr.bf16.gmra.mrb[36].mxu1 %v609_v7  ;;  %1391 = vmatprep.subr.bf16.mxu0 %v1464_v12 }
 0x1aa   :  { %1273 = vmatprep.mubr.msk.bf16.mxu1 %vm572_vm2, %v547_v5 }
 0x1ac   :  { %1392 = vmatpush3.bf16.msra.mxu0 %v1464_v12 }
 0x1ae   :  { %v571_v9 = vpop.permute.xlu1 %570 }
 0x1af   :  { %v569_v43 = vpop.permute.xlu0 %568  ;;  %v617_v0 = vsel %vm572_vm2, %v538_v53, %v571_v9 }
 0x1b0   :  { %v613_v8 = vsel %vm572_vm2, %v536_v39, %v569_v43 }
 0x1b1   :  { %860 = vmatmul.mubr.bf16.gmra.mrb[40].mxu1 %v613_v8 }
 0x1b2   :  { %867 = vmatprep.mubr.bf16.mxu1 %v1501_v11  ;;  %v1465_v11 = vld [vmem:[%s2029_s5 + $0x18] sm:$0xff]  }
 0x1b3   :  { %1393 = vmatprep.subr.bf16.mxu0 %v1465_v11 }
 0x1b4   :  { %1394 = vmatpush3.bf16.msra.mxu0 %v1465_v11 }
 0x1b5   :  { %1395 = vmatprep.subr.bf16.mxu0 %v1466_v59 }
 0x1b8   :  { %1396 = vmatpush3.bf16.msra.mxu0 %v1466_v59 }
 0x1b9   :  { %868 = vmatmul.mubr.bf16.gmra.mrb[44].mxu1 %v617_v0  ;;  %1397 = vmatprep.subr.bf16.mxu0 %v1467_v60 }
 0x1bc   :  { %1398 = vmatpush3.bf16.msra.mxu0 %v1467_v60 }
 0x231   :  { %v781_v14 = vpop.f32.mrb[0].mxu1 }
 0x232   :  { %v783_v15 = vpop.f32.mrb[1].mxu1  ;;  %v782_v22 = vadd.f32 %v1933_v20, %v781_v14 }
 0x233   :  { %v784_v16 = vpop.f32.mrb[2].mxu1 }
 0x234   :  { %v786_v19 = vpop.f32.mrb[3].mxu1  ;;  %v876_v28 = vmax.f32 %v782_v22, 0.0  ;;  %v785_v30 = vadd.f32 %v1933_v20, %v784_v16 }
 0x236   :  { %v877_v37 = vmax.f32 %v785_v30, 0.0 }
 0x23c   :  { %v789_v21 = vpop.f32.mrb[4].mxu1 }
 0x23d   :  { %v791_v24 = vpop.f32.mrb[5].mxu1  ;;  %v790_v33 = vadd.f32 %v1933_v20, %v789_v21 }
 0x23e   :  { %v792_v25 = vpop.f32.mrb[6].mxu1  ;;  %v1468_v24 = vld [vmem:[%s2029_s5 + $0x30] sm:$0xff]  }
 0x23f   :  { %v793_v26 = vadd.f32 %v1933_v20, %v792_v25  ;;  %v794_v27 = vpop.f32.mrb[7].mxu1  ;;  %v878_v41 = vmax.f32 %v790_v33, 0.0  ;;  %v1469_v25 = vld [vmem:[%s2029_s5 + $0x38] sm:$0xff]   ;;  %1399 = vmatprep.subr.bf16.mxu0 %v1468_v24 }
 0x240   :  { %1400 = vmatpush3.bf16.msra.mxu0 %v1468_v24 }
 0x241   :  { %v879_v29 = vmax.f32 %v793_v26, 0.0  ;;  %1401 = vmatprep.subr.bf16.mxu0 %v1469_v25 }
 0x243   :  { %v1938_v31 = vmax.f32 %v876_v28, %v879_v29 }
 0x244   :  { %v797_v32 = vpop.f32.mrb[8].mxu1  ;;  %1402 = vmatpush3.bf16.msra.mxu0 %v1469_v25 }
 0x245   :  { %v798_v34 = vadd.f32 %v1933_v20, %v797_v32  ;;  %v799_v35 = vpop.f32.mrb[9].mxu1 }
 0x246   :  { %v800_v36 = vpop.f32.mrb[10].mxu1 }
 0x247   :  { %v880_v38 = vmax.f32 %v798_v34, 0.0  ;;  %v801_v39 = vadd.f32 %v1933_v20, %v800_v36  ;;  %v802_v40 = vpop.f32.mrb[11].mxu1 }
 0x249   :  { %v1943_v42 = vmax.f32 %v877_v37, %v880_v38  ;;  %v881_v44 = vmax.f32 %v801_v39, 0.0 }
 0x24b   :  { %v1945_v45 = vmax.f32 %v878_v41, %v881_v44 }
 0x24c   :  { %v805_v46 = vpop.f32.mrb[12].mxu1 }
 0x24d   :  { %v807_v47 = vpop.f32.mrb[13].mxu1  ;;  %v806_v53 = vadd.f32 %v1933_v20, %v805_v46 }
 0x24e   :  { %v808_v48 = vpop.f32.mrb[14].mxu1 }
 0x24f   :  { %v810_v50 = vpop.f32.mrb[15].mxu1  ;;  %v882_v57 = vmax.f32 %v806_v53, 0.0  ;;  %v809_v49 = vadd.f32 %v1933_v20, %v808_v48 }
 0x251   :  { %v883_v51 = vmax.f32 %v809_v49, 0.0 }
 0x254   :  { %v813_v52 = vpop.f32.mrb[16].mxu1 }
 0x255   :  { %v815_v23 = vpop.f32.mrb[17].mxu1  ;;  %v814_v18 = vadd.f32 %v1933_v20, %v813_v52 }
 0x256   :  { %v816_v54 = vpop.f32.mrb[18].mxu1 }
 0x257   :  { %v817_v55 = vadd.f32 %v1933_v20, %v816_v54  ;;  %v818_v56 = vpop.f32.mrb[19].mxu1  ;;  %v884_v4 = vmax.f32 %v814_v18, 0.0 }
 0x259   :  { %v885_v58 = vmax.f32 %v817_v55, 0.0 }
 0x25b   :  { %v903_v13 = vmax.f32 %v882_v57, %v885_v58 }
 0x25c   :  { %v821_v61 = vpop.f32.mrb[20].mxu1 }
 0x25d   :  { %v822_v62 = vadd.f32 %v1933_v20, %v821_v61  ;;  %v823_v17 = vpop.f32.mrb[21].mxu1 }
 0x25e   :  { %v824_v63 = vpop.f32.mrb[22].mxu1  ;;  %v1470_v17 = vld [vmem:[%s2031_s7] sm:$0xff]  }
 0x25f   :  { %v886_v2 = vmax.f32 %v822_v62, 0.0  ;;  %v825_v3 = vadd.f32 %v1933_v20, %v824_v63  ;;  %v826_v6 = vpop.f32.mrb[23].mxu1  ;;  %1407 = vmatprep.subr.bf16.mxu0 %v1470_v17 }
 0x261   :  { %v904_v7 = vmax.f32 %v883_v51, %v886_v2  ;;  %v887_v5 = vmax.f32 %v825_v3, 0.0 }
 0x263   :  { %v905_v43 = vmax.f32 %v884_v4, %v887_v5  ;;  %v1434_v8 = vpack.i.bf16 %v904_v7, %v903_v13 }
 0x264   :  { %v829_v9 = vpop.f32.mrb[24].mxu1 }
 0x265   :  { %v831_v0 = vpop.f32.mrb[25].mxu1  ;;  %919 = vrot.lane.b32.xlu1 %v905_v43, %s1503_s11  ;;  %1435 = vrot.lane.b32.xlu0 %v1434_v8, %s1503_s11  ;;  %v830_v11 = vadd.f32 %v1933_v20, %v829_v9 }
 0x266   :  { %v832_v10 = vpop.f32.mrb[26].mxu1 }
 0x267   :  { %v834_v1 = vpop.f32.mrb[27].mxu1  ;;  %v888_v21 = vmax.f32 %v830_v11, 0.0  ;;  %v833_v26 = vadd.f32 %v1933_v20, %v832_v10 }
 0x269   :  { %v889_v34 = vmax.f32 %v833_v26, 0.0 }
 0x26c   :  { %v837_v12 = vpop.f32.mrb[28].mxu1 }
 0x26d   :  { %v839_v14 = vpop.f32.mrb[29].mxu1  ;;  %v838_v29 = vadd.f32 %v1933_v20, %v837_v12 }
 0x26e   :  { %v840_v15 = vpop.f32.mrb[30].mxu1 }
 0x26f   :  { %v841_v16 = vadd.f32 %v1933_v20, %v840_v15  ;;  %v842_v19 = vpop.f32.mrb[31].mxu1  ;;  %v890_v38 = vmax.f32 %v838_v29, 0.0 }
 0x271   :  { %v891_v22 = vmax.f32 %v841_v16, 0.0 }
 0x273   :  { %v906_v27 = vmax.f32 %v888_v21, %v891_v22 }
 0x274   :  { %v845_v28 = vpop.f32.mrb[32].mxu1 }
 0x275   :  { %v846_v30 = vadd.f32 %v1933_v20, %v845_v28  ;;  %v847_v32 = vpop.f32.mrb[33].mxu1 }
 0x276   :  { %v848_v33 = vpop.f32.mrb[34].mxu1 }
 0x277   :  { %v892_v35 = vmax.f32 %v846_v30, 0.0  ;;  %v849_v36 = vadd.f32 %v1933_v20, %v848_v33  ;;  %v850_v37 = vpop.f32.mrb[35].mxu1 }
 0x279   :  { %v907_v39 = vmax.f32 %v889_v34, %v892_v35  ;;  %v893_v40 = vmax.f32 %v849_v36, 0.0  ;;  %v1474_v34 = vld [vmem:[%s2031_s7 + $0x20] sm:$0xff]   ;;  %v1475_v35 = vld [vmem:[%s2031_s7 + $0x28] sm:$0xff]   ;;  %v1476_v36 = vld [vmem:[%s2031_s7 + $0x30] ss:$0 sps:$4 sm:$0x33]  }
 0x27a   :  { %v1153_v37 = vsel %vm1151_vm7, %v1476_v36, 0 }
 0x27b   :  { %v908_v41 = vmax.f32 %v890_v38, %v893_v40  ;;  %v1439_v44 = vpack.i.bf16 %v907_v39, %v906_v27  ;;  %v1274_v38 = vld [vmem:[%s2030_s6] ss:$0 sm:$0xff]  ;;  %s1505_s6 = smov [#allocation2]  }
 0x27c   :  { %v853_v46 = vpop.f32.mrb[36].mxu1  ;;  %s1211_s4 = sshll.u32 %s1505_s6, 4  ;;  %s1212_s4 = int_to_ptr.vmem [resolvable:$true] %s1211_s4 }
 0x27d   :  { %v855_v47 = vpop.f32.mrb[37].mxu1  ;;  %931 = vrot.lane.b32.xlu1 %v908_v41, %s1502_s2  ;;  %1440 = vrot.lane.b32.xlu0 %v1439_v44, %s1502_s2  ;;  %v854_v53 = vadd.f32 %v1933_v20, %v853_v46  ;;  %s1477_s29 = scalar_lea.vmem %s1212_s4, 384  ;;  %p1482_p1 = scmp.lt.s32.totalorder %s1212_s4, %s1212_s4 }
 0x27e   :  { %v856_v48 = vpop.f32.mrb[38].mxu1  ;;  %p1478_p0 = scmp.ne.s32.totalorder %s1212_s4, %s1477_s29  ;;  %p1483_p2 = scmp.lt.s32.totalorder %s1477_s29, %s1477_s29 }
 0x27f   :  { %v858_v50 = vpop.f32.mrb[39].mxu1  ;;  %v894_v57 = vmax.f32 %v854_v53, 0.0  ;;  %v857_v59 = vadd.f32 %v1933_v20, %v856_v48 }
 0x280   :  { %p1484_p3 = por %p1483_p2, %p1482_p1 }
 0x281   :  { %v895_v63 = vmax.f32 %v857_v59, 0.0 }
 0x282   :  { %p1485_p4 = pnand %p1484_p3, %p1478_p0 }
 0x284   :  { %v861_v52 = vpop.f32.mrb[40].mxu1 }
 0x285   :  { %v863_v23 = vpop.f32.mrb[41].mxu1  ;;  %v862_v13 = vadd.f32 %v1933_v20, %v861_v52 }
 0x286   :  { %v864_v54 = vpop.f32.mrb[42].mxu1 }
 0x287   :  { %v865_v55 = vadd.f32 %v1933_v20, %v864_v54  ;;  %v866_v56 = vpop.f32.mrb[43].mxu1  ;;  %v896_v6 = vmax.f32 %v862_v13, 0.0 }
 0x289   :  { %v897_v58 = vmax.f32 %v865_v55, 0.0  ;;  %v1283_v55 = vld [vmem:[%s2032_s8] ss:$0 sm:$0xff] }
 0x28b   :  { %v909_v60 = vmax.f32 %v894_v57, %v897_v58 }
 0x28c   :  { %v869_v49 = vpop.f32.mrb[44].mxu1 }
 0x28d   :  { %v870_v61 = vadd.f32 %v1933_v20, %v869_v49  ;;  %v871_v18 = vpop.f32.mrb[45].mxu1 }
 0x28e   :  { %v872_v62 = vpop.f32.mrb[46].mxu1 }
 0x28f   :  { %v898_v51 = vmax.f32 %v870_v61, 0.0  ;;  %v873_v2 = vadd.f32 %v1933_v20, %v872_v62  ;;  %v874_v3 = vpop.f32.mrb[47].mxu1 }
 0x291   :  { %v910_v4 = vmax.f32 %v895_v63, %v898_v51  ;;  %v899_v7 = vmax.f32 %v873_v2, 0.0 }
 0x293   :  { %v911_v5 = vmax.f32 %v896_v6, %v899_v7  ;;  %v1444_v43 = vpack.i.bf16 %v910_v4, %v909_v60 }
 0x295   :  { %943 = vrot.lane.b32.xlu1 %v911_v5, %s1504_s17  ;;  %1445 = vrot.lane.b32.xlu0 %v1444_v43, %s1504_s17 }
 0x2d7   :  { %v1436_v8 = vpop.permute.xlu0 %1435  ;;  %v920_v9 = vpop.permute.xlu1 %919 }
 0x2d8   :  { %v1437_v10 = vunpack.i.l.bf16 %v1436_v8  ;;  %v1438_v12 = vunpack.i.h.bf16 %v1436_v8  ;;  %v951_v20 = vsel %vm948_vm5, %v1945_v45, %v920_v9  ;;  %v1473_v45 = vld [vmem:[%s2031_s7 + $0x18] sm:$0xff]  }
 0x2da   :  { %v949_v15 = vsel %vm948_vm5, %v1938_v31, %v1437_v10  ;;  %v950_v21 = vsel %vm948_vm5, %v1943_v42, %v1438_v12  ;;  %v1471_v31 = vld [vmem:[%s2031_s7 + $0x8] sm:$0xff]   ;;  %v1472_v42 = vld [vmem:[%s2031_s7 + $0x10] sm:$0xff]  }
 0x2ef   :  { %v1441_v0 = vpop.permute.xlu0 %1440  ;;  %v932_v1 = vpop.permute.xlu1 %931 }
 0x2f0   :  { %v1443_v11 = vunpack.i.h.bf16 %v1441_v0  ;;  %v1442_v14 = vunpack.i.l.bf16 %v1441_v0  ;;  %v954_v22 = vsel %vm572_vm2, %v951_v20, %v932_v1 }
 0x2f2   :  { %v952_v26 = vsel %vm572_vm2, %v949_v15, %v1442_v14  ;;  %v953_v27 = vsel %vm572_vm2, %v950_v21, %v1443_v11 }
 0x307   :  { %v944_v16 = vpop.permute.xlu1 %943  ;;  %v1446_v19 = vpop.permute.xlu0 %1445 }
 0x308   :  { %v1448_v24 = vunpack.i.h.bf16 %v1446_v19  ;;  %v1447_v25 = vunpack.i.l.bf16 %v1446_v19  ;;  %v958_v28 = vsel %vm955_vm6, %v954_v22, %v944_v16 }
 0x309   :  { %v960_v33 = vpack.c.bf16 %v958_v28, %v958_v28 }
 0x30a   :  { %v956_v29 = vsel %vm955_vm6, %v952_v26, %v1447_v25  ;;  %v957_v30 = vsel %vm955_vm6, %v953_v27, %v1448_v24 }
 0x30b   :  { %v959_v32 = vpack.c.bf16 %v957_v30, %v956_v29 }
 0x30d   :  { %1403 = vmatprep.mubr.bf16.mxu0 %v959_v32 }
 0x30e   :  { %1404 = vmatmul.mubr.bf16.vlgmr.msra.gmra.mrb[48].mxu0 %v960_v33 }
 0x30f   :  { %1408 = vmatpush3.bf16.msra.mxu0 %v1470_v17 }
 0x310   :  { %1409 = vmatprep.subr.bf16.mxu0 %v1471_v31 }
 0x313   :  { %1410 = vmatpush3.bf16.msra.mxu0 %v1471_v31 }
 0x314   :  { %1411 = vmatprep.subr.bf16.mxu0 %v1472_v42 }
 0x317   :  { %1412 = vmatpush3.bf16.msra.mxu0 %v1472_v42 }
 0x318   :  { %1413 = vmatprep.subr.bf16.mxu0 %v1473_v45 }
 0x31b   :  { %1414 = vmatpush3.bf16.msra.mxu0 %v1473_v45 }
 0x31c   :  { %1415 = vmatprep.subr.bf16.mxu0 %v1474_v34 }
 0x31f   :  { %1416 = vmatpush3.bf16.msra.mxu0 %v1474_v34 }
 0x320   :  { %1417 = vmatprep.subr.bf16.mxu0 %v1475_v35 }
 0x323   :  { %1418 = vmatpush3.bf16.msra.mxu0 %v1475_v35 }
 0x324   :  { %1426 = vmatprep.subr.msk.bf16.mxu0 %vm1151_vm7, %v1476_v36 }
 0x327   :  { %1420 = vmatpush3.bf16.msra.mxu0 %v1153_v37 }
 0x3e1   :  { %v1405_v39 = vpop.f32.mrb[48].mxu0 }
 0x3e2   :  { %v1075_v40 = vadd.f32 %v1405_v39, %v1274_v38  ;;  %v1066_v41 = vpop.f32.mrb[49].mxu0 }
 0x3e3   :  { %v1067_v44 = vadd.f32 %v1274_v38, %v1066_v41  ;;  %v1406_v46 = vpop.f32.mrb[50].mxu0 }
 0x3e4   :  { %v1069_v47 = vpop.f32.mrb[51].mxu0  ;;  %v1082_v50 = vmax.f32 %v1075_v40, 0.0 }
 0x3e5   :  { %v1070_v48 = vadd.f32 %v1274_v38, %v1069_v47  ;;  %v1080_v52 = vmax.f32 %v1067_v44, 0.0 }
 0x3e6   :  { %v1084_v54 = vpack.c.bf16 %v1082_v50, %v1082_v50 }
 0x3e7   :  { %v1081_v53 = vmax.f32 %v1070_v48, 0.0 }
 0x3e9   :  { %v1083_v23 = vpack.c.bf16 %v1081_v53, %v1080_v52 }
 0x3eb   :  { %1421 = vmatprep.mubr.msk.bf16.mxu0 %vm1144_vm8, %v1083_v23 }
 0x3ec   :  { %1422 = vmatmul.mubr.msk.bf16.vlgmr.msra.gmra.mrb[52].mxu0 %vm1144_vm8, %v1084_v54 }
 0x4bf   :  { %v1423_v56 = vpop.f32.mrb[52].mxu0 }
 0x4c0   :  { %v1198_v57 = vadd.f32 %v1423_v56, %v1283_v55  ;;  %v1189_v58 = vpop.f32.mrb[53].mxu0 }
 0x4c1   :  { %v1190_v59 = vadd.f32 %v1283_v55, %v1189_v58  ;;  %v1424_v60 = vpop.f32.mrb[54].mxu0 }
 0x4c2   :  { %1205 = vst [vmem:[#allocation2 + $0x10] sm:$0xff] %v1198_v57  ;;  %v1192_v49 = vpop.f32.mrb[55].mxu0 }
 0x4c3   :  { %1203 = vst [vmem:[#allocation2] sm:$0xff] %v1190_v59  ;;  %v1193_v13 = vadd.f32 %v1283_v55, %v1192_v49 }
 0x4c5   :  { %1204 = vst [vmem:[#allocation2 + $0x8] sm:$0xff] %v1193_v13 }
 0x4c6   :  { %1488 = shalt.err (!%p1485_p4)
}
 0x4c7   :  { %s1489_s10 = scalar_lea.hbm %s2033_s9, 384 }
 0x4c8   :  { %p1490_p5 = scmp.ne.s32.totalorder %s2033_s9, %s1489_s10  ;;  %p1493_p6 = scmp.lt.u32.totalorder %s1489_s10, %s2033_s9 }
 0x4ca   :  { %p1495_p7 = pnand %p1493_p6, %p1490_p5 }
 0x4cc   :  { %1498 = shalt.err (!%p1495_p7)
}
 0x4cd   :  { %s1506_s15 = smov 128   ;;  %s1507_s5 = smov 8  }
 0x4ce   :  { %1217 = dma.vmem_to_hbm [thread:$0]  %s1212_s4, 384, %s2033_s9, [#allocation3], %s1506_s15, %s1506_s15, %s1507_s5  }
 0x4cf   :  { %1499 = dma.done.wait [#allocation3], 384  }
 0x4d0   :  { %1500 = vsyncadd [#allocation3], 4294966912 }
 0x4d1   :  { %1221 = vsyncpa [#allocation3], 1 }

</bundles_post_ra>
